<compile_context>
chip_gen: v7x
topology: tpu7x:2x2x1
jax: 0.10.0
libtpu: 0.0.40
codegen_flags: <defaults>
</compile_context>

<pallas_src>
import jax
import jax.numpy as jnp
from jax.experimental import pallas as pl
from jax.experimental.pallas import tpu as pltpu


def _label_param_kernel(idx_ref, feat_ref, s_ref, t_ref, hist_ref,
                        out_ref, newhist_ref):
    """One (TB, n_class) tile of batch rows; tables are fully VMEM-resident.

    idx_ref      : SMEM  [padded_batch] int32  (scalar prefetch)
    feat_ref     : VMEM  [TB, n_class]         (rows [i*TB, (i+1)*TB) of feature)
    s/t/hist_ref : VMEM  [n_samples, n_class]  (whole tables, loaded once)
    out_ref      : VMEM  [TB, n_class]         (feature + new history)
    newhist_ref  : VMEM  [TB, n_class]         (updated history rows)
    """
    tb = feat_ref.shape[0]
    base = pl.program_id(0) * tb

    # TB is a small static constant (8..128): trace-time unrolled loop.  Each
    # iteration is an independent row gather + fused elementwise update, so
    # the LLO scheduler can interleave the VMEM loads/stores freely.
    for j in range(tb):
        row = idx_ref[base + j]                                   # SMEM scalar
        s_row = s_ref[pl.ds(row, 1), :].astype(jnp.float32)       # (1, n_class)
        t_row = t_ref[pl.ds(row, 1), :].astype(jnp.float32)
        h_row = hist_ref[pl.ds(row, 1), :].astype(jnp.float32)

        param_y = s_row * s_row - t_row * t_row
        new_h = jnp.float32(0.3) * param_y + jnp.float32(0.7) * h_row

        newhist_ref[pl.ds(j, 1), :] = new_h.astype(newhist_ref.dtype)
        out_ref[pl.ds(j, 1), :] = (
            feat_ref[pl.ds(j, 1), :].astype(jnp.float32) + new_h
        ).astype(out_ref.dtype)


def _forward_impl(feature, idx, s, t, history):
    """Returns ((feature + history_new, feature), updated_history_buffer)."""
    batch, n_class = feature.shape
    n_samples = s.shape[0]
    idx = idx.astype(jnp.int32)

    # Batch tile: >=8 rows (full sublanes), <=128 so several tiles remain in
    # the grid to keep the pipeline (and v7x's two TensorCores) busy.
    tb = max(8, min(128, batch))
    padded_batch = pl.cdiv(batch, tb) * tb
    pad = padded_batch - batch
    feat_p = jnp.pad(feature, ((0, pad), (0, 0))) if pad else feature
    idx_p = jnp.pad(idx, (0, pad)) if pad else idx   # pad rows gather row 0

    grid = (padded_batch // tb,)

    itemsize = jnp.dtype(feature.dtype).itemsize
    table_bytes = 3 * n_samples * n_class * 4                 # s, t, history
    io_bytes = 3 * 2 * tb * n_class * itemsize                # feat + 2 outs, 2-buf
    # TODO(synk): if the tables exceed the VMEM budget, switch to the manual
    # batched-gather double-buffer path (memory_space=pl.ANY + make_async_copy).
    vmem_limit = min(64 * 1024 * 1024,
                     max(32 * 1024 * 1024,
                         2 * table_bytes + 2 * io_bytes + (4 << 20)))

    grid_spec = pltpu.PrefetchScalarGridSpec(
        num_scalar_prefetch=1,            # idx -> SMEM, read inside the kernel
        grid=grid,
        in_specs=[
            # feature rows for this tile
            pl.BlockSpec((tb, n_class), lambda i, idx_ref: (i, 0)),
            # whole tables, constant block index -> DMA'd once, VMEM-resident
            pl.BlockSpec((n_samples, n_class), lambda i, idx_ref: (0, 0)),  # s
            pl.BlockSpec((n_samples, n_class), lambda i, idx_ref: (0, 0)),  # t
            pl.BlockSpec((n_samples, n_class), lambda i, idx_ref: (0, 0)),  # hist
        ],
        out_specs=(
            pl.BlockSpec((tb, n_class), lambda i, idx_ref: (i, 0)),  # out
            pl.BlockSpec((tb, n_class), lambda i, idx_ref: (i, 0)),  # new rows
        ),
    )

    out_p, new_rows_p = pl.pallas_call(
        _label_param_kernel,
        out_shape=(
            jax.ShapeDtypeStruct((padded_batch, n_class), feature.dtype),
            jax.ShapeDtypeStruct((padded_batch, n_class), history.dtype),
        ),
        grid_spec=grid_spec,
        compiler_params=pltpu.CompilerParams(
            dimension_semantics=("parallel",),   # megacore sharding on v7x
            vmem_limit_bytes=vmem_limit,
        ),
    )(idx_p, feat_p, s, t, history)

    out = out_p[:batch]
    new_rows = new_rows_p[:batch]

    # Stateful buffer update (PyTorch: self.history[idx] = history.detach()).
    # Done in the wrapper so every gathered row reads the ORIGINAL history even
    # with duplicate idx.  With the history argument donated this lowers to an
    # in-place scatter (no full-table copy).
    updated_history = history.at[idx].set(new_rows)

    # y is the unmodified input feature -- no copy, no extra kernel output.
    return (out, feature), updated_history


# history (arg 4) is donated so the scatter aliases the input buffer in place.
label_parameterization_forward = jax.jit(_forward_impl, donate_argnums=(4,))


def _reference(feature, idx, s, t, history):
    param_y = s[idx] * s[idx] - t[idx] * t[idx]
    hist = 0.3 * param_y + 0.7 * history[idx]
    return (feature + hist, feature), history.at[idx].set(hist)


if __name__ == "__main__":
    n_samples, n_class, batch = 16, 128, 8

    key = jax.random.PRNGKey(0)
    k_s, k_t, k_f, k_i, k_h = jax.random.split(key, 5)

    # Deterministic 'gaussian' init (mean=0.0, std=0.0001), matching __init__.
    s = (0.0001 * jax.random.normal(k_s, (n_samples, n_class))).astype(jnp.float32)
    t = (0.0001 * jax.random.normal(k_t, (n_samples, n_class))).astype(jnp.float32)
    # history starts as zeros in the module; use nonzero here to exercise the path.
    history = jax.random.normal(k_h, (n_samples, n_class)).astype(jnp.float32)

    feature = jax.random.normal(k_f, (batch, n_class)).astype(jnp.float32)
    idx = jax.random.randint(k_i, (batch,), 0, n_samples, dtype=jnp.int32)
    # Force a duplicate index to exercise the duplicate-idx semantics.
    idx = idx.at[1].set(idx[0])

    # Reference is computed BEFORE the jitted call because `history` is donated.
    (ref_out, ref_y), ref_history = _reference(feature, idx, s, t, history)
    jax.block_until_ready(ref_history)

    (out, y), new_history = label_parameterization_forward(feature, idx, s, t, history)
    jax.block_until_ready((out, y, new_history))

    assert jnp.allclose(out, ref_out, atol=1e-5, rtol=1e-5)
    assert jnp.allclose(y, ref_y)
    assert jnp.allclose(new_history, ref_history, atol=1e-5, rtol=1e-5)

    print("KERNEL_OK")
</pallas_src>

<mosaic_0001>
module attributes {stable_mosaic.version = 11 : i64} {
  func.func @_label_param_kernel(%arg0: i32, %arg1: memref<8xi32, #tpu.memory_space<smem>>, %arg2: memref<8x128xf32, #tpu.memory_space<vmem>>, %arg3: memref<16x128xf32, #tpu.memory_space<vmem>>, %arg4: memref<16x128xf32, #tpu.memory_space<vmem>>, %arg5: memref<16x128xf32, #tpu.memory_space<vmem>>, %arg6: memref<8x128xf32, #tpu.memory_space<vmem>>, %arg7: memref<8x128xf32, #tpu.memory_space<vmem>>) attributes {dimension_semantics = [#tpu.dimension_semantics<parallel>], iteration_bounds = array<i64: 1>, scalar_prefetch = 1 : i64, scratch_operands = 0 : i64, tpu.core_type = #tpu.core_type<tc>, window_params = [{transform_indices = @transform_0, window_bounds = array<i64: 8, 128>}, {pipeline_mode = #tpu.pipeline_mode<synchronous>, transform_indices = @transform_1, window_bounds = array<i64: 16, 128>}, {pipeline_mode = #tpu.pipeline_mode<synchronous>, transform_indices = @transform_2, window_bounds = array<i64: 16, 128>}, {pipeline_mode = #tpu.pipeline_mode<synchronous>, transform_indices = @transform_3, window_bounds = array<i64: 16, 128>}, {transform_indices = @transform_4, window_bounds = array<i64: 8, 128>}, {transform_indices = @transform_5, window_bounds = array<i64: 8, 128>}]} {
    %c8_i32 = arith.constant 8 : i32
    %0 = arith.muli %arg0, %c8_i32 : i32
    %c0_i32 = arith.constant 0 : i32
    %1 = arith.addi %0, %c0_i32 : i32
    %2 = arith.index_cast %1 : i32 to index
    %3 = memref.load %arg1[%2] : memref<8xi32, #tpu.memory_space<smem>>
    %4 = arith.index_cast %3 : i32 to index
    %c0 = arith.constant 0 : index
    %5 = vector.load %arg3[%4, %c0] : memref<16x128xf32, #tpu.memory_space<vmem>>, vector<1x128xf32>
    %6 = arith.index_cast %3 : i32 to index
    %c0_0 = arith.constant 0 : index
    %7 = vector.load %arg4[%6, %c0_0] : memref<16x128xf32, #tpu.memory_space<vmem>>, vector<1x128xf32>
    %8 = arith.index_cast %3 : i32 to index
    %c0_1 = arith.constant 0 : index
    %9 = vector.load %arg5[%8, %c0_1] : memref<16x128xf32, #tpu.memory_space<vmem>>, vector<1x128xf32>
    %10 = arith.mulf %5, %5 : vector<1x128xf32>
    %11 = arith.mulf %7, %7 : vector<1x128xf32>
    %12 = arith.subf %10, %11 : vector<1x128xf32>
    %cst = arith.constant 3.000000e-01 : f32
    %13 = vector.broadcast %cst : f32 to vector<1x128xf32>
    %14 = arith.mulf %13, %12 : vector<1x128xf32>
    %cst_2 = arith.constant 0.699999988 : f32
    %15 = vector.broadcast %cst_2 : f32 to vector<1x128xf32>
    %16 = arith.mulf %15, %9 : vector<1x128xf32>
    %17 = arith.addf %14, %16 : vector<1x128xf32>
    %c0_3 = arith.constant 0 : index
    %c0_4 = arith.constant 0 : index
    %18 = vector.load %arg7[%c0_3, %c0_4] : memref<8x128xf32, #tpu.memory_space<vmem>>, vector<1x128xf32>
    tpu.vector_store %arg7[%c0_3, %c0_4], %17 {strides = array<i32>} : memref<8x128xf32, #tpu.memory_space<vmem>>, vector<1x128xf32>,
    %c0_5 = arith.constant 0 : index
    %c0_6 = arith.constant 0 : index
    %19 = vector.load %arg2[%c0_5, %c0_6] : memref<8x128xf32, #tpu.memory_space<vmem>>, vector<1x128xf32>
    %20 = arith.addf %19, %17 : vector<1x128xf32>
    %c0_7 = arith.constant 0 : index
    %c0_8 = arith.constant 0 : index
    %21 = vector.load %arg6[%c0_7, %c0_8] : memref<8x128xf32, #tpu.memory_space<vmem>>, vector<1x128xf32>
    tpu.vector_store %arg6[%c0_7, %c0_8], %20 {strides = array<i32>} : memref<8x128xf32, #tpu.memory_space<vmem>>, vector<1x128xf32>,
    %c1_i32 = arith.constant 1 : i32
    %22 = arith.addi %0, %c1_i32 : i32
    %23 = arith.index_cast %22 : i32 to index
    %24 = memref.load %arg1[%23] : memref<8xi32, #tpu.memory_space<smem>>
    %25 = arith.index_cast %24 : i32 to index
    %c0_9 = arith.constant 0 : index
    %26 = vector.load %arg3[%25, %c0_9] : memref<16x128xf32, #tpu.memory_space<vmem>>, vector<1x128xf32>
    %27 = arith.index_cast %24 : i32 to index
    %c0_10 = arith.constant 0 : index
    %28 = vector.load %arg4[%27, %c0_10] : memref<16x128xf32, #tpu.memory_space<vmem>>, vector<1x128xf32>
    %29 = arith.index_cast %24 : i32 to index
    %c0_11 = arith.constant 0 : index
    %30 = vector.load %arg5[%29, %c0_11] : memref<16x128xf32, #tpu.memory_space<vmem>>, vector<1x128xf32>
    %31 = arith.mulf %26, %26 : vector<1x128xf32>
    %32 = arith.mulf %28, %28 : vector<1x128xf32>
    %33 = arith.subf %31, %32 : vector<1x128xf32>
    %cst_12 = arith.constant 3.000000e-01 : f32
    %34 = vector.broadcast %cst_12 : f32 to vector<1x128xf32>
    %35 = arith.mulf %34, %33 : vector<1x128xf32>
    %cst_13 = arith.constant 0.699999988 : f32
    %36 = vector.broadcast %cst_13 : f32 to vector<1x128xf32>
    %37 = arith.mulf %36, %30 : vector<1x128xf32>
    %38 = arith.addf %35, %37 : vector<1x128xf32>
    %c1 = arith.constant 1 : index
    %c0_14 = arith.constant 0 : index
    %39 = vector.load %arg7[%c1, %c0_14] : memref<8x128xf32, #tpu.memory_space<vmem>>, vector<1x128xf32>
    tpu.vector_store %arg7[%c1, %c0_14], %38 {strides = array<i32>} : memref<8x128xf32, #tpu.memory_space<vmem>>, vector<1x128xf32>,
    %c1_15 = arith.constant 1 : index
    %c0_16 = arith.constant 0 : index
    %40 = vector.load %arg2[%c1_15, %c0_16] : memref<8x128xf32, #tpu.memory_space<vmem>>, vector<1x128xf32>
    %41 = arith.addf %40, %38 : vector<1x128xf32>
    %c1_17 = arith.constant 1 : index
    %c0_18 = arith.constant 0 : index
    %42 = vector.load %arg6[%c1_17, %c0_18] : memref<8x128xf32, #tpu.memory_space<vmem>>, vector<1x128xf32>
    tpu.vector_store %arg6[%c1_17, %c0_18], %41 {strides = array<i32>} : memref<8x128xf32, #tpu.memory_space<vmem>>, vector<1x128xf32>,
    %c2_i32 = arith.constant 2 : i32
    %43 = arith.addi %0, %c2_i32 : i32
    %44 = arith.index_cast %43 : i32 to index
    %45 = memref.load %arg1[%44] : memref<8xi32, #tpu.memory_space<smem>>
    %46 = arith.index_cast %45 : i32 to index
    %c0_19 = arith.constant 0 : index
    %47 = vector.load %arg3[%46, %c0_19] : memref<16x128xf32, #tpu.memory_space<vmem>>, vector<1x128xf32>
    %48 = arith.index_cast %45 : i32 to index
    %c0_20 = arith.constant 0 : index
    %49 = vector.load %arg4[%48, %c0_20] : memref<16x128xf32, #tpu.memory_space<vmem>>, vector<1x128xf32>
    %50 = arith.index_cast %45 : i32 to index
    %c0_21 = arith.constant 0 : index
    %51 = vector.load %arg5[%50, %c0_21] : memref<16x128xf32, #tpu.memory_space<vmem>>, vector<1x128xf32>
    %52 = arith.mulf %47, %47 : vector<1x128xf32>
    %53 = arith.mulf %49, %49 : vector<1x128xf32>
    %54 = arith.subf %52, %53 : vector<1x128xf32>
    %cst_22 = arith.constant 3.000000e-01 : f32
    %55 = vector.broadcast %cst_22 : f32 to vector<1x128xf32>
    %56 = arith.mulf %55, %54 : vector<1x128xf32>
    %cst_23 = arith.constant 0.699999988 : f32
    %57 = vector.broadcast %cst_23 : f32 to vector<1x128xf32>
    %58 = arith.mulf %57, %51 : vector<1x128xf32>
    %59 = arith.addf %56, %58 : vector<1x128xf32>
    %c2 = arith.constant 2 : index
    %c0_24 = arith.constant 0 : index
    %60 = vector.load %arg7[%c2, %c0_24] : memref<8x128xf32, #tpu.memory_space<vmem>>, vector<1x128xf32>
    tpu.vector_store %arg7[%c2, %c0_24], %59 {strides = array<i32>} : memref<8x128xf32, #tpu.memory_space<vmem>>, vector<1x128xf32>,
    %c2_25 = arith.constant 2 : index
    %c0_26 = arith.constant 0 : index
    %61 = vector.load %arg2[%c2_25, %c0_26] : memref<8x128xf32, #tpu.memory_space<vmem>>, vector<1x128xf32>
    %62 = arith.addf %61, %59 : vector<1x128xf32>
    %c2_27 = arith.constant 2 : index
    %c0_28 = arith.constant 0 : index
    %63 = vector.load %arg6[%c2_27, %c0_28] : memref<8x128xf32, #tpu.memory_space<vmem>>, vector<1x128xf32>
    tpu.vector_store %arg6[%c2_27, %c0_28], %62 {strides = array<i32>} : memref<8x128xf32, #tpu.memory_space<vmem>>, vector<1x128xf32>,
    %c3_i32 = arith.constant 3 : i32
    %64 = arith.addi %0, %c3_i32 : i32
    %65 = arith.index_cast %64 : i32 to index
    %66 = memref.load %arg1[%65] : memref<8xi32, #tpu.memory_space<smem>>
    %67 = arith.index_cast %66 : i32 to index
    %c0_29 = arith.constant 0 : index
    %68 = vector.load %arg3[%67, %c0_29] : memref<16x128xf32, #tpu.memory_space<vmem>>, vector<1x128xf32>
    %69 = arith.index_cast %66 : i32 to index
    %c0_30 = arith.constant 0 : index
    %70 = vector.load %arg4[%69, %c0_30] : memref<16x128xf32, #tpu.memory_space<vmem>>, vector<1x128xf32>
    %71 = arith.index_cast %66 : i32 to index
    %c0_31 = arith.constant 0 : index
    %72 = vector.load %arg5[%71, %c0_31] : memref<16x128xf32, #tpu.memory_space<vmem>>, vector<1x128xf32>
    %73 = arith.mulf %68, %68 : vector<1x128xf32>
    %74 = arith.mulf %70, %70 : vector<1x128xf32>
    %75 = arith.subf %73, %74 : vector<1x128xf32>
    %cst_32 = arith.constant 3.000000e-01 : f32
    %76 = vector.broadcast %cst_32 : f32 to vector<1x128xf32>
    %77 = arith.mulf %76, %75 : vector<1x128xf32>
    %cst_33 = arith.constant 0.699999988 : f32
    %78 = vector.broadcast %cst_33 : f32 to vector<1x128xf32>
    %79 = arith.mulf %78, %72 : vector<1x128xf32>
    %80 = arith.addf %77, %79 : vector<1x128xf32>
    %c3 = arith.constant 3 : index
    %c0_34 = arith.constant 0 : index
    %81 = vector.load %arg7[%c3, %c0_34] : memref<8x128xf32, #tpu.memory_space<vmem>>, vector<1x128xf32>
    tpu.vector_store %arg7[%c3, %c0_34], %80 {strides = array<i32>} : memref<8x128xf32, #tpu.memory_space<vmem>>, vector<1x128xf32>,
    %c3_35 = arith.constant 3 : index
    %c0_36 = arith.constant 0 : index
    %82 = vector.load %arg2[%c3_35, %c0_36] : memref<8x128xf32, #tpu.memory_space<vmem>>, vector<1x128xf32>
    %83 = arith.addf %82, %80 : vector<1x128xf32>
    %c3_37 = arith.constant 3 : index
    %c0_38 = arith.constant 0 : index
    %84 = vector.load %arg6[%c3_37, %c0_38] : memref<8x128xf32, #tpu.memory_space<vmem>>, vector<1x128xf32>
    tpu.vector_store %arg6[%c3_37, %c0_38], %83 {strides = array<i32>} : memref<8x128xf32, #tpu.memory_space<vmem>>, vector<1x128xf32>,
    %c4_i32 = arith.constant 4 : i32
    %85 = arith.addi %0, %c4_i32 : i32
    %86 = arith.index_cast %85 : i32 to index
    %87 = memref.load %arg1[%86] : memref<8xi32, #tpu.memory_space<smem>>
    %88 = arith.index_cast %87 : i32 to index
    %c0_39 = arith.constant 0 : index
    %89 = vector.load %arg3[%88, %c0_39] : memref<16x128xf32, #tpu.memory_space<vmem>>, vector<1x128xf32>
    %90 = arith.index_cast %87 : i32 to index
    %c0_40 = arith.constant 0 : index
    %91 = vector.load %arg4[%90, %c0_40] : memref<16x128xf32, #tpu.memory_space<vmem>>, vector<1x128xf32>
    %92 = arith.index_cast %87 : i32 to index
    %c0_41 = arith.constant 0 : index
    %93 = vector.load %arg5[%92, %c0_41] : memref<16x128xf32, #tpu.memory_space<vmem>>, vector<1x128xf32>
    %94 = arith.mulf %89, %89 : vector<1x128xf32>
    %95 = arith.mulf %91, %91 : vector<1x128xf32>
    %96 = arith.subf %94, %95 : vector<1x128xf32>
    %cst_42 = arith.constant 3.000000e-01 : f32
    %97 = vector.broadcast %cst_42 : f32 to vector<1x128xf32>
    %98 = arith.mulf %97, %96 : vector<1x128xf32>
    %cst_43 = arith.constant 0.699999988 : f32
    %99 = vector.broadcast %cst_43 : f32 to vector<1x128xf32>
    %100 = arith.mulf %99, %93 : vector<1x128xf32>
    %101 = arith.addf %98, %100 : vector<1x128xf32>
    %c4 = arith.constant 4 : index
    %c0_44 = arith.constant 0 : index
    %102 = vector.load %arg7[%c4, %c0_44] : memref<8x128xf32, #tpu.memory_space<vmem>>, vector<1x128xf32>
    tpu.vector_store %arg7[%c4, %c0_44], %101 {strides = array<i32>} : memref<8x128xf32, #tpu.memory_space<vmem>>, vector<1x128xf32>,
    %c4_45 = arith.constant 4 : index
    %c0_46 = arith.constant 0 : index
    %103 = vector.load %arg2[%c4_45, %c0_46] : memref<8x128xf32, #tpu.memory_space<vmem>>, vector<1x128xf32>
    %104 = arith.addf %103, %101 : vector<1x128xf32>
    %c4_47 = arith.constant 4 : index
    %c0_48 = arith.constant 0 : index
    %105 = vector.load %arg6[%c4_47, %c0_48] : memref<8x128xf32, #tpu.memory_space<vmem>>, vector<1x128xf32>
    tpu.vector_store %arg6[%c4_47, %c0_48], %104 {strides = array<i32>} : memref<8x128xf32, #tpu.memory_space<vmem>>, vector<1x128xf32>,
    %c5_i32 = arith.constant 5 : i32
    %106 = arith.addi %0, %c5_i32 : i32
    %107 = arith.index_cast %106 : i32 to index
    %108 = memref.load %arg1[%107] : memref<8xi32, #tpu.memory_space<smem>>
    %109 = arith.index_cast %108 : i32 to index
    %c0_49 = arith.constant 0 : index
    %110 = vector.load %arg3[%109, %c0_49] : memref<16x128xf32, #tpu.memory_space<vmem>>, vector<1x128xf32>
    %111 = arith.index_cast %108 : i32 to index
    %c0_50 = arith.constant 0 : index
    %112 = vector.load %arg4[%111, %c0_50] : memref<16x128xf32, #tpu.memory_space<vmem>>, vector<1x128xf32>
    %113 = arith.index_cast %108 : i32 to index
    %c0_51 = arith.constant 0 : index
    %114 = vector.load %arg5[%113, %c0_51] : memref<16x128xf32, #tpu.memory_space<vmem>>, vector<1x128xf32>
    %115 = arith.mulf %110, %110 : vector<1x128xf32>
    %116 = arith.mulf %112, %112 : vector<1x128xf32>
    %117 = arith.subf %115, %116 : vector<1x128xf32>
    %cst_52 = arith.constant 3.000000e-01 : f32
    %118 = vector.broadcast %cst_52 : f32 to vector<1x128xf32>
    %119 = arith.mulf %118, %117 : vector<1x128xf32>
    %cst_53 = arith.constant 0.699999988 : f32
    %120 = vector.broadcast %cst_53 : f32 to vector<1x128xf32>
    %121 = arith.mulf %120, %114 : vector<1x128xf32>
    %122 = arith.addf %119, %121 : vector<1x128xf32>
    %c5 = arith.constant 5 : index
    %c0_54 = arith.constant 0 : index
    %123 = vector.load %arg7[%c5, %c0_54] : memref<8x128xf32, #tpu.memory_space<vmem>>, vector<1x128xf32>
    tpu.vector_store %arg7[%c5, %c0_54], %122 {strides = array<i32>} : memref<8x128xf32, #tpu.memory_space<vmem>>, vector<1x128xf32>,
    %c5_55 = arith.constant 5 : index
    %c0_56 = arith.constant 0 : index
    %124 = vector.load %arg2[%c5_55, %c0_56] : memref<8x128xf32, #tpu.memory_space<vmem>>, vector<1x128xf32>
    %125 = arith.addf %124, %122 : vector<1x128xf32>
    %c5_57 = arith.constant 5 : index
    %c0_58 = arith.constant 0 : index
    %126 = vector.load %arg6[%c5_57, %c0_58] : memref<8x128xf32, #tpu.memory_space<vmem>>, vector<1x128xf32>
    tpu.vector_store %arg6[%c5_57, %c0_58], %125 {strides = array<i32>} : memref<8x128xf32, #tpu.memory_space<vmem>>, vector<1x128xf32>,
    %c6_i32 = arith.constant 6 : i32
    %127 = arith.addi %0, %c6_i32 : i32
    %128 = arith.index_cast %127 : i32 to index
    %129 = memref.load %arg1[%128] : memref<8xi32, #tpu.memory_space<smem>>
    %130 = arith.index_cast %129 : i32 to index
    %c0_59 = arith.constant 0 : index
    %131 = vector.load %arg3[%130, %c0_59] : memref<16x128xf32, #tpu.memory_space<vmem>>, vector<1x128xf32>
    %132 = arith.index_cast %129 : i32 to index
    %c0_60 = arith.constant 0 : index
    %133 = vector.load %arg4[%132, %c0_60] : memref<16x128xf32, #tpu.memory_space<vmem>>, vector<1x128xf32>
    %134 = arith.index_cast %129 : i32 to index
    %c0_61 = arith.constant 0 : index
    %135 = vector.load %arg5[%134, %c0_61] : memref<16x128xf32, #tpu.memory_space<vmem>>, vector<1x128xf32>
    %136 = arith.mulf %131, %131 : vector<1x128xf32>
    %137 = arith.mulf %133, %133 : vector<1x128xf32>
    %138 = arith.subf %136, %137 : vector<1x128xf32>
    %cst_62 = arith.constant 3.000000e-01 : f32
    %139 = vector.broadcast %cst_62 : f32 to vector<1x128xf32>
    %140 = arith.mulf %139, %138 : vector<1x128xf32>
    %cst_63 = arith.constant 0.699999988 : f32
    %141 = vector.broadcast %cst_63 : f32 to vector<1x128xf32>
    %142 = arith.mulf %141, %135 : vector<1x128xf32>
    %143 = arith.addf %140, %142 : vector<1x128xf32>
    %c6 = arith.constant 6 : index
    %c0_64 = arith.constant 0 : index
    %144 = vector.load %arg7[%c6, %c0_64] : memref<8x128xf32, #tpu.memory_space<vmem>>, vector<1x128xf32>
    tpu.vector_store %arg7[%c6, %c0_64], %143 {strides = array<i32>} : memref<8x128xf32, #tpu.memory_space<vmem>>, vector<1x128xf32>,
    %c6_65 = arith.constant 6 : index
    %c0_66 = arith.constant 0 : index
    %145 = vector.load %arg2[%c6_65, %c0_66] : memref<8x128xf32, #tpu.memory_space<vmem>>, vector<1x128xf32>
    %146 = arith.addf %145, %143 : vector<1x128xf32>
    %c6_67 = arith.constant 6 : index
    %c0_68 = arith.constant 0 : index
    %147 = vector.load %arg6[%c6_67, %c0_68] : memref<8x128xf32, #tpu.memory_space<vmem>>, vector<1x128xf32>
    tpu.vector_store %arg6[%c6_67, %c0_68], %146 {strides = array<i32>} : memref<8x128xf32, #tpu.memory_space<vmem>>, vector<1x128xf32>,
    %c7_i32 = arith.constant 7 : i32
    %148 = arith.addi %0, %c7_i32 : i32
    %149 = arith.index_cast %148 : i32 to index
    %150 = memref.load %arg1[%149] : memref<8xi32, #tpu.memory_space<smem>>
    %151 = arith.index_cast %150 : i32 to index
    %c0_69 = arith.constant 0 : index
    %152 = vector.load %arg3[%151, %c0_69] : memref<16x128xf32, #tpu.memory_space<vmem>>, vector<1x128xf32>
    %153 = arith.index_cast %150 : i32 to index
    %c0_70 = arith.constant 0 : index
    %154 = vector.load %arg4[%153, %c0_70] : memref<16x128xf32, #tpu.memory_space<vmem>>, vector<1x128xf32>
    %155 = arith.index_cast %150 : i32 to index
    %c0_71 = arith.constant 0 : index
    %156 = vector.load %arg5[%155, %c0_71] : memref<16x128xf32, #tpu.memory_space<vmem>>, vector<1x128xf32>
    %157 = arith.mulf %152, %152 : vector<1x128xf32>
    %158 = arith.mulf %154, %154 : vector<1x128xf32>
    %159 = arith.subf %157, %158 : vector<1x128xf32>
    %cst_72 = arith.constant 3.000000e-01 : f32
    %160 = vector.broadcast %cst_72 : f32 to vector<1x128xf32>
    %161 = arith.mulf %160, %159 : vector<1x128xf32>
    %cst_73 = arith.constant 0.699999988 : f32
    %162 = vector.broadcast %cst_73 : f32 to vector<1x128xf32>
    %163 = arith.mulf %162, %156 : vector<1x128xf32>
    %164 = arith.addf %161, %163 : vector<1x128xf32>
    %c7 = arith.constant 7 : index
    %c0_74 = arith.constant 0 : index
    %165 = vector.load %arg7[%c7, %c0_74] : memref<8x128xf32, #tpu.memory_space<vmem>>, vector<1x128xf32>
    tpu.vector_store %arg7[%c7, %c0_74], %164 {strides = array<i32>} : memref<8x128xf32, #tpu.memory_space<vmem>>, vector<1x128xf32>,
    %c7_75 = arith.constant 7 : index
    %c0_76 = arith.constant 0 : index
    %166 = vector.load %arg2[%c7_75, %c0_76] : memref<8x128xf32, #tpu.memory_space<vmem>>, vector<1x128xf32>
    %167 = arith.addf %166, %164 : vector<1x128xf32>
    %c7_77 = arith.constant 7 : index
    %c0_78 = arith.constant 0 : index
    %168 = vector.load %arg6[%c7_77, %c0_78] : memref<8x128xf32, #tpu.memory_space<vmem>>, vector<1x128xf32>
    tpu.vector_store %arg6[%c7_77, %c0_78], %167 {strides = array<i32>} : memref<8x128xf32, #tpu.memory_space<vmem>>, vector<1x128xf32>,
    return
  }
  func.func @transform_0(%arg0: i32, %arg1: memref<8xi32, #tpu.memory_space<smem>>) -> (i32, i32) {
    %c0_i32 = arith.constant 0 : i32
    %c0_i32_0 = arith.constant 0 : i32
    return %arg0, %c0_i32 : i32, i32
  }
  func.func @transform_1(%arg0: i32, %arg1: memref<8xi32, #tpu.memory_space<smem>>) -> (i32, i32) {
    %c0_i32 = arith.constant 0 : i32
    %c0_i32_0 = arith.constant 0 : i32
    %c0_i32_1 = arith.constant 0 : i32
    return %c0_i32, %c0_i32_0 : i32, i32
  }
  func.func @transform_2(%arg0: i32, %arg1: memref<8xi32, #tpu.memory_space<smem>>) -> (i32, i32) {
    %c0_i32 = arith.constant 0 : i32
    %c0_i32_0 = arith.constant 0 : i32
    %c0_i32_1 = arith.constant 0 : i32
    return %c0_i32, %c0_i32_0 : i32, i32
  }
  func.func @transform_3(%arg0: i32, %arg1: memref<8xi32, #tpu.memory_space<smem>>) -> (i32, i32) {
    %c0_i32 = arith.constant 0 : i32
    %c0_i32_0 = arith.constant 0 : i32
    %c0_i32_1 = arith.constant 0 : i32
    return %c0_i32, %c0_i32_0 : i32, i32
  }
  func.func @transform_4(%arg0: i32, %arg1: memref<8xi32, #tpu.memory_space<smem>>) -> (i32, i32) {
    %c0_i32 = arith.constant 0 : i32
    %c0_i32_0 = arith.constant 0 : i32
    return %arg0, %c0_i32 : i32, i32
  }
  func.func @transform_5(%arg0: i32, %arg1: memref<8xi32, #tpu.memory_space<smem>>) -> (i32, i32) {
    %c0_i32 = arith.constant 0 : i32
    %c0_i32_0 = arith.constant 0 : i32
    return %arg0, %c0_i32 : i32, i32
  }
}

</mosaic_0001>

<bundles_post_ra>
// kernel: _forward_impl.1
= control target key start
LH: loop header
LB: loop body
LE: loop exit
PB: predicated region body
PF: predicated region fallthrough
CT: control target
= control target key end

     0   :  { %s565_s0 = inlined_call_operand.vmem [shape: s32[8], index: 0, kind: input, shape index: {}]   ;;  %s566_s1 = inlined_call_operand.vmem [shape: f32[8,128], index: 1, kind: input, shape index: {}]   ;;  %s567_s2 = inlined_call_operand.hbm [shape: f32[16,128], index: 2, kind: input, shape index: {}]   ;;  %s568_s3 = inlined_call_operand.hbm [shape: f32[16,128], index: 3, kind: input, shape index: {}]   ;;  %s569_s4 = inlined_call_operand.hbm [shape: f32[16,128], index: 4, kind: input, shape index: {}]   ;;  %s570_s5 = inlined_call_operand.hbm [shape: f32[8,128], index: 5, kind: output, shape index: {0}]   ;;  %s571_s6 = inlined_call_operand.vmem [shape: f32[8,128], index: 6, kind: output, shape index: {1}]  }
   0x1   :  { %s12_s23 = sshll.u32 %s565_s0, 4  ;;  %s13_s23 = int_to_ptr.vmem [resolvable:$true] %s12_s23 }
   0x2   :  { %s270_s24 = scalar_lea.vmem %s13_s23, 16  ;;  %p275_p1 = scmp.lt.s32.totalorder %s13_s23, %s13_s23 }
   0x3   :  { %p271_p0 = scmp.ne.s32.totalorder %s13_s23, %s270_s24  ;;  %p276_p2 = scmp.lt.s32.totalorder %s270_s24, %s270_s24 }
   0x5   :  { %p277_p3 = por %p276_p2, %p275_p1 }
   0x7   :  { %p278_p4 = pnand %p277_p3, %p271_p0 }
   0x9   :  { %281 = shalt.err (!%p278_p4)  }
   0xa   :  { %s378_s25 = smov [#allocation3]  }
   0xb   :  { %15 = dma.vmem_to_smem %s13_s23, 16, %s378_s25, [#allocation2] }
   0xc   :  { %370 = dma.done.wait [#allocation2], 16 }
   0xd   :  { %371 = vsyncadd [#allocation2], 4294967280 }
   0xe   :  { %17 = sfence }
   0xf   :  { %18 = vsyncpa [#allocation5], 0 }
  0x10   :  { %19 = vsyncpa [#allocation8], 0 }
  0x11   :  { %20 = vsyncpa [#allocation6], 0  ;;  %s379_s26 = smov [#allocation7]   ;;  %s380_s28 = smov [#allocation4]  }
  0x12   :  { %s40_s27 = sshll.u32 %s379_s26, 4  ;;  %s28_s0 = sshll.u32 %s380_s28, 4  ;;  %s41_s27 = int_to_ptr.vmem [resolvable:$true] %s40_s27  ;;  %s423_s0 = int_to_ptr.vmem [resolvable:$true] %s28_s0 }
  0x13   :  { %s282_s7 = scalar_lea.hbm %s568_s3, 256 }
  0x14   :  { %p283_p5 = scmp.ne.s32.totalorder %s568_s3, %s282_s7  ;;  %p286_p6 = scmp.lt.u32.totalorder %s282_s7, %s568_s3 }
  0x16   :  { %p288_p7 = pnand %p286_p6, %p283_p5 }
  0x18   :  { %291 = shalt.err (!%p288_p7)
}
  0x19   :  { %s292_s12 = scalar_lea.vmem %s41_s27, 256  ;;  %p297_p9 = scmp.lt.s32.totalorder %s41_s27, %s41_s27 }
  0x1a   :  { %p293_p8 = scmp.ne.s32.totalorder %s41_s27, %s292_s12  ;;  %p298_p10 = scmp.lt.s32.totalorder %s292_s12, %s292_s12 }
  0x1c   :  { %p299_p11 = por %p298_p10, %p297_p9 }
  0x1e   :  { %p300_p12 = pnand %p299_p11, %p293_p8 }
  0x20   :  { %303 = shalt.err (!%p300_p12)
}
  0x21   :  { %s381_s13 = smov 128   ;;  %s382_s14 = smov 8  }
  0x22   :  { %46 = dma.hbm_to_vmem [thread:$0]  %s568_s3, 256, %s41_s27, [#allocation8], %s381_s13, %s381_s13, %s382_s14  }
  0x23   :  { %s304_s19 = scalar_lea.hbm %s567_s2, 256 }
  0x24   :  { %p305_p13 = scmp.ne.s32.totalorder %s567_s2, %s304_s19  ;;  %p308_p0 = scmp.lt.u32.totalorder %s304_s19, %s567_s2 }
  0x26   :  { %p310_p1 = pnand %p308_p0, %p305_p13 }
  0x28   :  { %313 = shalt.err (!%p310_p1)
}
  0x29   :  { %s314_s24 = scalar_lea.vmem %s423_s0, 256  ;;  %p319_p3 = scmp.lt.s32.totalorder %s423_s0, %s423_s0 }
  0x2a   :  { %p315_p2 = scmp.ne.s32.totalorder %s423_s0, %s314_s24  ;;  %p320_p4 = scmp.lt.s32.totalorder %s314_s24, %s314_s24 }
  0x2c   :  { %p321_p5 = por %p320_p4, %p319_p3 }
  0x2e   :  { %p322_p6 = pnand %p321_p5, %p315_p2 }
  0x30   :  { %325 = shalt.err (!%p322_p6)
}
  0x31   :  { %34 = dma.hbm_to_vmem [thread:$0]  %s567_s2, 256, %s423_s0, [#allocation5], %s381_s13, %s381_s13, %s382_s14  }
  0x32   :  { %s383_s26 = smov [#allocation9]   ;;  %s326_s30 = scalar_lea.hbm %s569_s4, 256 }
  0x33   :  { %s52_s27 = sshll.u32 %s383_s26, 4  ;;  %p327_p7 = scmp.ne.s32.totalorder %s569_s4, %s326_s30  ;;  %s53_s27 = int_to_ptr.vmem [resolvable:$true] %s52_s27 }
  0x34   :  { %p330_p8 = scmp.lt.u32.totalorder %s326_s30, %s569_s4 }
  0x36   :  { %p332_p9 = pnand %p330_p8, %p327_p7 }
  0x38   :  { %335 = shalt.err (!%p332_p9)
}
  0x39   :  { %s336_s11 = scalar_lea.vmem %s53_s27, 256  ;;  %p341_p11 = scmp.lt.s32.totalorder %s53_s27, %s53_s27 }
  0x3a   :  { %p337_p10 = scmp.ne.s32.totalorder %s53_s27, %s336_s11  ;;  %p342_p12 = scmp.lt.s32.totalorder %s336_s11, %s336_s11 }
  0x3c   :  { %p343_p13 = por %p342_p12, %p341_p11 }
  0x3e   :  { %p344_p0 = pnand %p343_p13, %p337_p10 }
  0x40   :  { %347 = shalt.err (!%p344_p0)
}
  0x41   :  { %58 = dma.hbm_to_vmem [thread:$0]  %s569_s4, 256, %s53_s27, [#allocation8], %s381_s13, %s381_s13, %s382_s14  }
  0x42   :  { %372 = dma.done.wait [#allocation5], 256  }
  0x43   :  { %373 = vsyncadd [#allocation5], 4294967040 }
  0x44   :  { %374 = dma.done.wait [#allocation8], 512  }
  0x45   :  { %375 = vsyncadd [#allocation8], 4294966784  ;;  %s69_s12 = sld [smem:[#allocation3]]  ;;  %s256_s15 = sld [smem:[#allocation3 + $0x1]]  ;;  %v83_v21 = vld [vmem:[%s566_s1] sm:$0x1] }
  0x46   :  { %s475_s16 = sld [smem:[#allocation3 + $0x2]]  ;;  %s477_s17 = sld [smem:[#allocation3 + $0x3]]  ;;  %v101_v29 = vld [vmem:[%s566_s1 + $0x1] sm:$0x1]  ;;  %v119_v36 = vld [vmem:[%s566_s1 + $0x2] sm:$0x1] }
  0x47   :  { %s479_s18 = sld [smem:[#allocation3 + $0x4]]  ;;  %s481_s19 = sld [smem:[#allocation3 + $0x5]]  ;;  %v137_v51 = vld [vmem:[%s566_s1 + $0x3] sm:$0x1]  ;;  %v155_v56 = vld [vmem:[%s566_s1 + $0x4] sm:$0x1] }
  0x48   :  { %s483_s20 = sld [smem:[#allocation3 + $0x6]]  ;;  %s485_s24 = sld [smem:[#allocation3 + $0x7]] }
  0x4b   :  { %s70_s21 = scalar_lea.vmem [#allocation4], %s69_s12  ;;  %s72_s22 = scalar_lea.vmem [#allocation7], %s69_s12 }
  0x4c   :  { %v71_v0 = vld [vmem:[%s70_s21] sm:$0x1]  ;;  %s74_s4 = scalar_lea.vmem [#allocation9], %s69_s12  ;;  %s88_s13 = scalar_lea.vmem [#allocation4], %s256_s15 }
  0x4d   :  { %v73_v1 = vld [vmem:[%s72_s22] sm:$0x1]  ;;  %v76_v3 = vmul.f32 %v71_v0, %v71_v0  ;;  %s90_s14 = scalar_lea.vmem [#allocation7], %s256_s15  ;;  %s92_s23 = scalar_lea.vmem [#allocation9], %s256_s15 }
  0x4e   :  { %v75_v2 = vld [vmem:[%s74_s4] sm:$0x1]  ;;  %v77_v4 = vmul.f32 %v73_v1, %v73_v1  ;;  %s106_s3 = scalar_lea.vmem [#allocation4], %s475_s16  ;;  %s108_s25 = scalar_lea.vmem [#allocation7], %s475_s16 }
  0x4f   :  { %v89_v5 = vld [vmem:[%s88_s13] sm:$0x1]  ;;  %v80_v10 = vmul.f32 0.7, %v75_v2  ;;  %s110_s26 = scalar_lea.vmem [#allocation9], %s475_s16  ;;  %s124_s27 = scalar_lea.vmem [#allocation4], %s477_s17 }
  0x50   :  { %v91_v6 = vld [vmem:[%s90_s14] sm:$0x1]  ;;  %v94_v8 = vmul.f32 %v89_v5, %v89_v5  ;;  %v78_v9 = vsub.f32 %v76_v3, %v77_v4  ;;  %s126_s30 = scalar_lea.vmem [#allocation7], %s477_s17  ;;  %s128_s7 = scalar_lea.vmem [#allocation9], %s477_s17 }
  0x51   :  { %v93_v7 = vld [vmem:[%s92_s23] sm:$0x1]  ;;  %v95_v11 = vmul.f32 %v91_v6, %v91_v6  ;;  %s142_s2 = scalar_lea.vmem [#allocation4], %s479_s18  ;;  %s144_s0 = scalar_lea.vmem [#allocation7], %s479_s18 }
  0x52   :  { %v98_v12 = vmul.f32 0.7, %v93_v7  ;;  %v107_v13 = vld [vmem:[%s106_s3] sm:$0x1]  ;;  %v79_v15 = vmul.f32 0.3, %v78_v9 }
  0x53   :  { %v109_v14 = vld [vmem:[%s108_s25] sm:$0x1]  ;;  %v96_v16 = vsub.f32 %v94_v8, %v95_v11  ;;  %v112_v18 = vmul.f32 %v107_v13, %v107_v13  ;;  %s146_s21 = scalar_lea.vmem [#allocation9], %s479_s18  ;;  %s160_s22 = scalar_lea.vmem [#allocation4], %s481_s19  ;;  %v173_v7 = vld [vmem:[%s566_s1 + $0x5] sm:$0x1] }
  0x54   :  { %v111_v17 = vld [vmem:[%s110_s26] sm:$0x1]  ;;  %v113_v19 = vmul.f32 %v109_v14, %v109_v14  ;;  %v81_v24 = vadd.f32 %v80_v10, %v79_v15  ;;  %s162_s4 = scalar_lea.vmem [#allocation7], %s481_s19  ;;  %s164_s18 = scalar_lea.vmem [#allocation9], %s481_s19 }
  0x55   :  { %v125_v20 = vld [vmem:[%s124_s27] sm:$0x1]  ;;  %v116_v22 = vmul.f32 0.7, %v111_v17  ;;  %v97_v25 = vmul.f32 0.3, %v96_v16 }
  0x56   :  { %v130_v23 = vmul.f32 %v125_v20, %v125_v20  ;;  %v114_v26 = vsub.f32 %v112_v18, %v113_v19  ;;  %v127_v27 = vld [vmem:[%s126_s30] sm:$0x1]  ;;  %v84_v31 = vadd.f32 %v83_v21, %v81_v24  ;;  %82 = vst [vmem:[%s571_s6] sm:$0x1] %v81_v24  ;;  %s178_s27 = scalar_lea.vmem [#allocation4], %s483_s20  ;;  %s180_s28 = scalar_lea.vmem [#allocation7], %s483_s20 }
  0x57   :  { %v129_v28 = vld [vmem:[%s128_s7] sm:$0x1]  ;;  %v131_v30 = vmul.f32 %v127_v27, %v127_v27  ;;  %v99_v32 = vadd.f32 %v98_v12, %v97_v25  ;;  %s182_s30 = scalar_lea.vmem [#allocation9], %s483_s20  ;;  %s196_s7 = scalar_lea.vmem [#allocation4], %s485_s24  ;;  %v191_v17 = vld [vmem:[%s566_s1 + $0x6] sm:$0x1] }
  0x58   :  { %v115_v33 = vmul.f32 0.3, %v114_v26  ;;  %v143_v34 = vld [vmem:[%s142_s2] sm:$0x1]  ;;  %v134_v38 = vmul.f32 0.7, %v129_v28 }
  0x59   :  { %v145_v35 = vld [vmem:[%s144_s0] sm:$0x1]  ;;  %v132_v37 = vsub.f32 %v130_v23, %v131_v30  ;;  %v148_v39 = vmul.f32 %v143_v34, %v143_v34  ;;  %85 = vst [vmem:[#allocation10] sm:$0x1] %v84_v31  ;;  %v102_v41 = vadd.f32 %v101_v29, %v99_v32  ;;  %100 = vst [vmem:[%s571_s6 + $0x1] sm:$0x1] %v99_v32 }
  0x5a   :  { %v149_v40 = vmul.f32 %v145_v35, %v145_v35  ;;  %v117_v42 = vadd.f32 %v116_v22, %v115_v33  ;;  %v147_v43 = vld [vmem:[%s146_s21] sm:$0x1]  ;;  %s198_s8 = scalar_lea.vmem [#allocation7], %s485_s24  ;;  %s200_s20 = scalar_lea.vmem [#allocation9], %s485_s24  ;;  %v209_v20 = vld [vmem:[%s566_s1 + $0x7] sm:$0x1] }
  0x5b   :  { %v161_v44 = vld [vmem:[%s160_s22] sm:$0x1]  ;;  %v133_v45 = vmul.f32 0.3, %v132_v37  ;;  %v152_v47 = vmul.f32 0.7, %v147_v43 }
  0x5c   :  { %v150_v46 = vsub.f32 %v148_v39, %v149_v40  ;;  %v163_v48 = vld [vmem:[%s162_s4] sm:$0x1]  ;;  %v166_v49 = vmul.f32 %v161_v44, %v161_v44  ;;  %103 = vst [vmem:[#allocation10 + $0x1] sm:$0x1] %v102_v41  ;;  %v120_v50 = vadd.f32 %v119_v36, %v117_v42  ;;  %118 = vst [vmem:[%s571_s6 + $0x2] sm:$0x1] %v117_v42 }
  0x5d   :  { %v165_v52 = vld [vmem:[%s164_s18] sm:$0x1]  ;;  %v167_v53 = vmul.f32 %v163_v48, %v163_v48  ;;  %v135_v54 = vadd.f32 %v134_v38, %v133_v45  ;;  %s384_s21 = smov [#allocation10]  }
  0x5e   :  { %v151_v55 = vmul.f32 0.3, %v150_v46  ;;  %v179_v57 = vld [vmem:[%s178_s27] sm:$0x1]  ;;  %121 = vst [vmem:[#allocation10 + $0x2] sm:$0x1] %v120_v50 }
  0x5f   :  { %v168_v58 = vsub.f32 %v166_v49, %v167_v53  ;;  %v170_v59 = vmul.f32 0.7, %v165_v52  ;;  %v181_v60 = vld [vmem:[%s180_s28] sm:$0x1]  ;;  %v184_v61 = vmul.f32 %v179_v57, %v179_v57  ;;  %v138_v62 = vadd.f32 %v137_v51, %v135_v54  ;;  %136 = vst [vmem:[%s571_s6 + $0x3] sm:$0x1] %v135_v54 }
  0x60   :  { %v153_v63 = vadd.f32 %v152_v47, %v151_v55  ;;  %v183_v0 = vld [vmem:[%s182_s30] sm:$0x1]  ;;  %v185_v1 = vmul.f32 %v181_v60, %v181_v60  ;;  %s218_s22 = sshll.u32 %s384_s21, 4  ;;  %s219_s22 = int_to_ptr.vmem [resolvable:$true] %s218_s22 }
  0x61   :  { %v197_v2 = vld [vmem:[%s196_s7] sm:$0x1]  ;;  %v169_v3 = vmul.f32 0.3, %v168_v58  ;;  %139 = vst [vmem:[#allocation10 + $0x3] sm:$0x1] %v138_v62  ;;  %p353_p2 = scmp.lt.s32.totalorder %s219_s22, %s219_s22 }
  0x62   :  { %v199_v4 = vld [vmem:[%s198_s8] sm:$0x1]  ;;  %v202_v5 = vmul.f32 %v197_v2, %v197_v2  ;;  %v156_v6 = vadd.f32 %v155_v56, %v153_v63  ;;  %154 = vst [vmem:[%s571_s6 + $0x4] sm:$0x1] %v153_v63  ;;  %v186_v8 = vsub.f32 %v184_v61, %v185_v1  ;;  %v188_v9 = vmul.f32 0.7, %v183_v0 }
  0x63   :  { %v201_v10 = vld [vmem:[%s200_s20] sm:$0x1]  ;;  %v203_v11 = vmul.f32 %v199_v4, %v199_v4  ;;  %v171_v12 = vadd.f32 %v170_v59, %v169_v3  ;;  %s348_s3 = scalar_lea.vmem %s219_s22, 128 }
  0x64   :  { %157 = vst [vmem:[#allocation10 + $0x4] sm:$0x1] %v156_v6  ;;  %v187_v13 = vmul.f32 0.3, %v186_v8  ;;  %v206_v15 = vmul.f32 0.7, %v201_v10  ;;  %p349_p1 = scmp.ne.s32.totalorder %s219_s22, %s348_s3  ;;  %p354_p3 = scmp.lt.s32.totalorder %s348_s3, %s348_s3 }
  0x65   :  { %v204_v14 = vsub.f32 %v202_v5, %v203_v11  ;;  %v174_v16 = vadd.f32 %v173_v7, %v171_v12  ;;  %172 = vst [vmem:[%s571_s6 + $0x5] sm:$0x1] %v171_v12 }
  0x66   :  { %v189_v18 = vadd.f32 %v188_v9, %v187_v13  ;;  %p355_p4 = por %p354_p3, %p353_p2 }
  0x67   :  { %v205_v19 = vmul.f32 0.3, %v204_v14  ;;  %175 = vst [vmem:[#allocation10 + $0x5] sm:$0x1] %v174_v16 }
  0x68   :  { %v192_v21 = vadd.f32 %v191_v17, %v189_v18  ;;  %190 = vst [vmem:[%s571_s6 + $0x6] sm:$0x1] %v189_v18  ;;  %p356_p5 = pnand %p355_p4, %p349_p1 }
  0x69   :  { %v207_v22 = vadd.f32 %v206_v15, %v205_v19 }
  0x6a   :  { %193 = vst [vmem:[#allocation10 + $0x6] sm:$0x1] %v192_v21 }
  0x6b   :  { %v210_v23 = vadd.f32 %v209_v20, %v207_v22  ;;  %208 = vst [vmem:[%s571_s6 + $0x7] sm:$0x1] %v207_v22 }
  0x6d   :  { %211 = vst [vmem:[#allocation10 + $0x7] sm:$0x1] %v210_v23 }
  0x6e   :  { %359 = shalt.err (!%p356_p5)
}
  0x6f   :  { %s360_s25 = scalar_lea.hbm %s570_s5, 128 }
  0x70   :  { %p361_p6 = scmp.ne.s32.totalorder %s570_s5, %s360_s25  ;;  %p364_p7 = scmp.lt.u32.totalorder %s360_s25, %s570_s5 }
  0x72   :  { %p366_p8 = pnand %p364_p7, %p361_p6 }
  0x74   :  { %369 = shalt.err (!%p366_p8)
}
  0x75   :  { %221 = dma.vmem_to_hbm [thread:$0]  %s219_s22, 128, %s570_s5, [#allocation6]  }
  0x76   :  { %376 = dma.done.wait [#allocation6], 128  }
  0x77   :  { %377 = vsyncadd [#allocation6], 4294967168 }
  0x78   :  { %229 = vsyncpa [#allocation5], 1 }
  0x79   :  { %230 = vsyncpa [#allocation8], 1 }
  0x7a   :  { %231 = vsyncpa [#allocation6], 1 }

</bundles_post_ra>
